<compile_context>
chip_gen: v7x
topology: tpu7x:2x2x1
jax: 0.10.0
libtpu: 0.0.40
codegen_flags: <defaults>
</compile_context>

<pallas_src>
import functools

import jax
import jax.numpy as jnp
from jax import lax
from jax.experimental import pallas as pl
from jax.experimental.pallas import tpu as pltpu

_VMEM_LIMIT = 32 * 1024 * 1024  # safe on v5e / v6e / v7x scoped-VMEM budgets


def _pick_tile(n, cap, align):
    """Largest divisor of n <= cap that is a multiple of `align`.

    Falls back to the full dimension (always a legal Mosaic block shape:
    "equal to the full array dim") if no aligned divisor exists under cap.
    """
    if n <= cap:
        return n
    for t in range(cap, 0, -1):
        if n % t == 0 and t % align == 0:
            return t
    return n


# ----------------------------------------------------------------------------
# Tiled linear kernels (x @ W^T [+ b])
# ----------------------------------------------------------------------------
def _matmul_kernel(x_ref, w_ref, o_ref, acc_ref):
    @pl.when(pl.program_id(2) == 0)
    def _():
        acc_ref[...] = jnp.zeros_like(acc_ref)

    acc_ref[...] += jnp.dot(x_ref[...], w_ref[...],
                            preferred_element_type=jnp.float32)

    @pl.when(pl.program_id(2) == pl.num_programs(2) - 1)
    def _():
        o_ref[...] = acc_ref[...].astype(o_ref.dtype)


def _matmul_bias_kernel(x_ref, w_ref, b_ref, o_ref, acc_ref):
    @pl.when(pl.program_id(2) == 0)
    def _():
        acc_ref[...] = jnp.zeros_like(acc_ref)

    acc_ref[...] += jnp.dot(x_ref[...], w_ref[...],
                            preferred_element_type=jnp.float32)

    @pl.when(pl.program_id(2) == pl.num_programs(2) - 1)
    def _():
        o_ref[...] = (acc_ref[...] + b_ref[...].astype(jnp.float32)
                      ).astype(o_ref.dtype)


def _pallas_linear(x2d, w_t, bias=None, *, out_dtype=None,
                   tm_cap=256, tn_cap=256, tk_cap=512):
    """x2d: (M, K), w_t: (K, N), bias: (N,) or None -> (M, N)."""
    M, K = x2d.shape
    K2, N = w_t.shape
    assert K == K2
    out_dtype = x2d.dtype if out_dtype is None else out_dtype

    tm = _pick_tile(M, tm_cap, 8)
    tn = _pick_tile(N, tn_cap, 128)
    tk = _pick_tile(K, tk_cap, 128)
    grid = (M // tm, N // tn, K // tk)

    out_shape = jax.ShapeDtypeStruct((M, N), out_dtype)
    compiler_params = pltpu.CompilerParams(
        dimension_semantics=("parallel", "parallel", "arbitrary"),
        vmem_limit_bytes=_VMEM_LIMIT,
    )
    scratch = [pltpu.VMEM((tm, tn), jnp.float32)]

    if bias is None:
        return pl.pallas_call(
            _matmul_kernel,
            out_shape=out_shape,
            grid=grid,
            in_specs=[
                pl.BlockSpec((tm, tk), lambda i, j, k: (i, k)),
                pl.BlockSpec((tk, tn), lambda i, j, k: (k, j)),
            ],
            out_specs=pl.BlockSpec((tm, tn), lambda i, j, k: (i, j)),
            scratch_shapes=scratch,
            compiler_params=compiler_params,
        )(x2d, w_t)

    bias2d = bias.reshape(1, N)
    return pl.pallas_call(
        _matmul_bias_kernel,
        out_shape=out_shape,
        grid=grid,
        in_specs=[
            pl.BlockSpec((tm, tk), lambda i, j, k: (i, k)),
            pl.BlockSpec((tk, tn), lambda i, j, k: (k, j)),
            pl.BlockSpec((1, tn), lambda i, j, k: (0, j)),
        ],
        out_specs=pl.BlockSpec((tm, tn), lambda i, j, k: (i, j)),
        scratch_shapes=scratch,
        compiler_params=compiler_params,
    )(x2d, w_t, bias2d)


# ----------------------------------------------------------------------------
# Flash-style attention kernel, (B, N, H*Dh) layout, heads handled in-kernel
# ----------------------------------------------------------------------------
def _attn_kernel(q_ref, kv_ref, o_ref, m_sc, l_sc, acc_sc, *,
                 heads, dim_head, scale, softmax):
    ki = pl.program_id(2)
    inner = heads * dim_head

    @pl.when(ki == 0)
    def _():
        m_sc[...] = jnp.full_like(m_sc, -jnp.inf)
        l_sc[...] = jnp.zeros_like(l_sc)
        acc_sc[...] = jnp.zeros_like(acc_sc)

    q = q_ref[0] * scale           # (tq, inner); scale folded into q
    kv = kv_ref[0]                 # (tk, 2*inner): [k | v]

    for h in range(heads):
        lo, hi = h * dim_head, (h + 1) * dim_head
        qh = q[:, lo:hi]                       # (tq, Dh)
        kh = kv[:, lo:hi]                      # (tk, Dh)
        vh = kv[:, inner + lo:inner + hi]      # (tk, Dh)

        # (tq, tk) scores; contracting-last-dim dot_general (no k.T)
        s = lax.dot_general(qh, kh, (((1,), (1,)), ((), ())),
                            preferred_element_type=jnp.float32)

        if softmax:
            m_prev = m_sc[h]                                       # (tq, 1)
            m_new = jnp.maximum(m_prev, jnp.max(s, axis=-1, keepdims=True))
            alpha = jnp.exp(m_prev - m_new)
            p = jnp.exp(s - m_new)
            l_sc[h] = alpha * l_sc[h] + jnp.sum(p, axis=-1, keepdims=True)
            acc_sc[h] = alpha * acc_sc[h] + jnp.dot(
                p.astype(vh.dtype), vh, preferred_element_type=jnp.float32)
            m_sc[h] = m_new
        else:
            acc_sc[h] = acc_sc[h] + jnp.dot(
                s.astype(vh.dtype), vh, preferred_element_type=jnp.float32)

    @pl.when(ki == pl.num_programs(2) - 1)
    def _():
        if softmax:
            inv_l = pl.reciprocal(l_sc[...], approx=True)          # (H, tq, 1)
            outs = [acc_sc[h] * inv_l[h] for h in range(heads)]
        else:
            outs = [acc_sc[h] for h in range(heads)]
        # Single lane-dense store of the full (tq, H*Dh) output tile.
        o_ref[0] = jnp.concatenate(outs, axis=-1).astype(o_ref.dtype)


def _pallas_attention(q, kv, *, heads, dim_head, scale, softmax,
                      tq_cap=256, tk_cap=512):
    """q: (B, Nq, H*Dh), kv: (B, Nk, 2*H*Dh) -> (B, Nq, H*Dh)."""
    B, Nq, inner = q.shape
    _, Nk, inner2 = kv.shape
    assert inner == heads * dim_head and inner2 == 2 * inner

    tq = _pick_tile(Nq, tq_cap, 8)
    tk = _pick_tile(Nk, tk_cap, 8)
    grid = (B, Nq // tq, Nk // tk)

    kernel = functools.partial(_attn_kernel, heads=heads, dim_head=dim_head,
                               scale=scale, softmax=softmax)
    return pl.pallas_call(
        kernel,
        out_shape=jax.ShapeDtypeStruct((B, Nq, inner), q.dtype),
        grid=grid,
        in_specs=[
            pl.BlockSpec((1, tq, inner), lambda b, qi, ki: (b, qi, 0)),
            pl.BlockSpec((1, tk, 2 * inner), lambda b, qi, ki: (b, ki, 0)),
        ],
        out_specs=pl.BlockSpec((1, tq, inner), lambda b, qi, ki: (b, qi, 0)),
        scratch_shapes=[
            pltpu.VMEM((heads, tq, 1), jnp.float32),         # running max
            pltpu.VMEM((heads, tq, 1), jnp.float32),         # running sum
            pltpu.VMEM((heads, tq, dim_head), jnp.float32),  # output accumulator
        ],
        compiler_params=pltpu.CompilerParams(
            dimension_semantics=("parallel", "parallel", "arbitrary"),
            vmem_limit_bytes=_VMEM_LIMIT,
        ),
    )(q, kv)


# ----------------------------------------------------------------------------
# Module wrapper
# ----------------------------------------------------------------------------
class CrossAttentionPallas:
    """JAX/Pallas port of Cross_Attention (Dropout(p=0) / eval is a no-op)."""

    def __init__(self, dim, heads=8, dim_head=64, dropout=0.0, softmax=True,
                 key=None, compute_dtype=jnp.float32,
                 attn_block_q=256, attn_block_k=512):
        inner_dim = dim_head * heads
        self.dim = dim
        self.heads = heads
        self.dim_head = dim_head
        self.inner_dim = inner_dim
        self.scale = dim ** (-0.5)      # NB: module scales by dim, not dim_head
        self.softmax = softmax
        self.compute_dtype = compute_dtype
        self.attn_block_q = attn_block_q
        self.attn_block_k = attn_block_k

        if key is None:
            key = jax.random.PRNGKey(0)
        kq, kk, kv, ko, kb = jax.random.split(key, 5)
        # PyTorch nn.Linear weight shape: (out_features, in_features)
        init = lambda k, shape, fan_in: (
            jax.random.uniform(k, shape, jnp.float32, -1.0, 1.0) / jnp.sqrt(fan_in)
        )
        self.w_q = init(kq, (inner_dim, dim), dim)
        self.w_k = init(kk, (inner_dim, dim), dim)
        self.w_v = init(kv, (inner_dim, dim), dim)
        self.w_out = init(ko, (dim, inner_dim), inner_dim)
        self.b_out = init(kb, (dim,), inner_dim)

        # Pre-transposed (and pre-cast) kernel weights; k/v fused into one
        # (dim, 2*inner) weight so the k and v projections are one matmul.
        cd = compute_dtype
        self.w_q_t = self.w_q.T.astype(cd)
        self.w_kv_t = jnp.concatenate([self.w_k, self.w_v], axis=0).T.astype(cd)
        self.w_out_t = self.w_out.T.astype(cd)

    def __call__(self, x, m, mask=None):
        # TODO(synk): mask path (F.pad + masked_fill) not implemented; mask=None only.
        assert mask is None
        b, nq, dim = x.shape
        nk = m.shape[1]
        inner = self.inner_dim
        cd = self.compute_dtype

        x2d = x.reshape(b * nq, dim).astype(cd)
        m2d = m.reshape(b * nk, dim).astype(cd)

        # q projection and fused k/v projection (tiled, pipelined matmuls)
        q = _pallas_linear(x2d, self.w_q_t, out_dtype=cd)       # (b*nq, inner)
        kvp = _pallas_linear(m2d, self.w_kv_t, out_dtype=cd)    # (b*nk, 2*inner)

        # Keep (B, N, H*Dh) layout; head selection happens inside the kernel,
        # so no (b,n,h,d)->(b,h,n,d) transposes / extra HBM round trips.
        q = q.reshape(b, nq, inner)
        kvp = kvp.reshape(b, nk, 2 * inner)

        out = _pallas_attention(q, kvp, heads=self.heads, dim_head=self.dim_head,
                                scale=self.scale, softmax=self.softmax,
                                tq_cap=self.attn_block_q, tk_cap=self.attn_block_k)

        # output projection (+ bias); Dropout(p=0) is a no-op
        out = _pallas_linear(out.reshape(b * nq, inner), self.w_out_t,
                             bias=self.b_out, out_dtype=x.dtype)
        return out.reshape(b, nq, dim)


# ----------------------------------------------------------------------------
# Reference (pure JAX) for a sanity check
# ----------------------------------------------------------------------------
def _reference(mod, x, m):
    b, nq, dim = x.shape
    nk = m.shape[1]
    h, dh = mod.heads, mod.dim_head
    q = x @ mod.w_q.T
    k = m @ mod.w_k.T
    v = m @ mod.w_v.T
    q = q.reshape(b, nq, h, dh).transpose(0, 2, 1, 3)
    k = k.reshape(b, nk, h, dh).transpose(0, 2, 1, 3)
    v = v.reshape(b, nk, h, dh).transpose(0, 2, 1, 3)
    dots = jnp.einsum("bhid,bhjd->bhij", q, k) * mod.scale
    attn = jax.nn.softmax(dots, axis=-1) if mod.softmax else dots
    out = jnp.einsum("bhij,bhjd->bhid", attn, v)
    out = out.transpose(0, 2, 1, 3).reshape(b, nq, h * dh)
    return out @ mod.w_out.T + mod.b_out


if __name__ == "__main__":
    key = jax.random.PRNGKey(0)
    kx, km, kp = jax.random.split(key, 3)

    B, Nq, Nk, DIM = 2, 8, 16, 32
    HEADS, DIM_HEAD = 2, 16

    x = jax.random.normal(kx, (B, Nq, DIM), jnp.float32)
    m = jax.random.normal(km, (B, Nk, DIM), jnp.float32)

    # attn_block_k=8 splits Nk=16 into two KV blocks so the online-softmax
    # (flash) accumulation path is actually exercised.
    mod = CrossAttentionPallas(DIM, heads=HEADS, dim_head=DIM_HEAD, key=kp,
                               attn_block_q=8, attn_block_k=8)
    out = jax.block_until_ready(mod(x, m))
    ref = _reference(mod, x, m)
    assert out.shape == (B, Nq, DIM)
    # Tolerance is sized for TPU matmul numerics: with DEFAULT precision both
    # the XLA reference and the kernel run f32 dots as bf16 MXU passes, and
    # the flash softmax reassociates the reduction, so ~1e-3..1e-2 absolute
    # differences are expected even for "f32" compute.
    assert jnp.allclose(out, ref, atol=3e-2, rtol=3e-2), "f32 mismatch vs reference"

    # bf16 matmul operands with f32 accumulation: looser tolerance.
    mod_bf16 = CrossAttentionPallas(DIM, heads=HEADS, dim_head=DIM_HEAD, key=kp,
                                    compute_dtype=jnp.bfloat16,
                                    attn_block_q=8, attn_block_k=8)
    out_bf16 = jax.block_until_ready(mod_bf16(x, m))
    assert out_bf16.shape == (B, Nq, DIM)
    assert jnp.allclose(out_bf16.astype(jnp.float32), ref,
                        atol=1.2e-1, rtol=1.2e-1), "bf16 mismatch vs reference"

    print("KERNEL_OK")
</pallas_src>

<mosaic_0001>
module attributes {stable_mosaic.version = 11 : i64} {
  func.func @_matmul_kernel(%arg0: i32, %arg1: i32, %arg2: i32, %arg3: memref<16x32xf32, #tpu.memory_space<vmem>>, %arg4: memref<32x32xf32, #tpu.memory_space<vmem>>, %arg5: memref<16x32xf32, #tpu.memory_space<vmem>>, %arg6: memref<16x32xf32, #tpu.memory_space<vmem>>) attributes {dimension_semantics = [#tpu.dimension_semantics<parallel>, #tpu.dimension_semantics<parallel>, #tpu.dimension_semantics<arbitrary>], iteration_bounds = array<i64: 1, 1, 1>, scalar_prefetch = 0 : i64, scratch_operands = 1 : i64, tpu.core_type = #tpu.core_type<tc>, window_params = [{transform_indices = @transform_0, window_bounds = array<i64: 16, 32>}, {transform_indices = @transform_1, window_bounds = array<i64: 32, 32>}, {transform_indices = @transform_2, window_bounds = array<i64: 16, 32>}]} {
    %c0_i32 = arith.constant 0 : i32
    %0 = arith.cmpi eq, %arg2, %c0_i32 : i32
    %1 = arith.extui %0 : i1 to i32
    %c0_i32_0 = arith.constant 0 : i32
    %2 = arith.cmpi ne, %1, %c0_i32_0 : i32
    scf.if %2 {
      %cst_10 = arith.constant 0.000000e+00 : f32
      %12 = vector.broadcast %cst_10 : f32 to vector<16x32xf32>
      %c0_11 = arith.constant 0 : index
      %c0_12 = arith.constant 0 : index
      %13 = vector.load %arg6[%c0_11, %c0_12] : memref<16x32xf32, #tpu.memory_space<vmem>>, vector<16x32xf32>
      tpu.vector_store %arg6[%c0_11, %c0_12], %12 {strides = array<i32>} : memref<16x32xf32, #tpu.memory_space<vmem>>, vector<16x32xf32>,
    } else {
    }
    %c0 = arith.constant 0 : index
    %c0_1 = arith.constant 0 : index
    %3 = vector.load %arg6[%c0, %c0_1] : memref<16x32xf32, #tpu.memory_space<vmem>>, vector<16x32xf32>
    %c0_2 = arith.constant 0 : index
    %c0_3 = arith.constant 0 : index
    %4 = vector.load %arg3[%c0_2, %c0_3] : memref<16x32xf32, #tpu.memory_space<vmem>>, vector<16x32xf32>
    %c0_4 = arith.constant 0 : index
    %c0_5 = arith.constant 0 : index
    %5 = vector.load %arg4[%c0_4, %c0_5] : memref<32x32xf32, #tpu.memory_space<vmem>>, vector<32x32xf32>
    %cst = arith.constant dense<0.000000e+00> : vector<16x32xf32>
    %6 = tpu.matmul %4, %5, %cst {dimension_numbers = #tpu.dot_dimension_numbers<[1], [0], [0], [1], [0, 0, 1, 1], [], []>} : vector<16x32xf32>, vector<32x32xf32>, vector<16x32xf32> -> vector<16x32xf32>
    %7 = arith.addf %3, %6 : vector<16x32xf32>
    %c0_6 = arith.constant 0 : index
    %c0_7 = arith.constant 0 : index
    %8 = vector.load %arg6[%c0_6, %c0_7] : memref<16x32xf32, #tpu.memory_space<vmem>>, vector<16x32xf32>
    tpu.vector_store %arg6[%c0_6, %c0_7], %7 {strides = array<i32>} : memref<16x32xf32, #tpu.memory_space<vmem>>, vector<16x32xf32>,
    %c0_i32_8 = arith.constant 0 : i32
    %9 = arith.cmpi eq, %arg2, %c0_i32_8 : i32
    %10 = arith.extui %9 : i1 to i32
    %c0_i32_9 = arith.constant 0 : i32
    %11 = arith.cmpi ne, %10, %c0_i32_9 : i32
    scf.if %11 {
      %c0_10 = arith.constant 0 : index
      %c0_11 = arith.constant 0 : index
      %12 = vector.load %arg6[%c0_10, %c0_11] : memref<16x32xf32, #tpu.memory_space<vmem>>, vector<16x32xf32>
      %c0_12 = arith.constant 0 : index
      %c0_13 = arith.constant 0 : index
      %13 = vector.load %arg5[%c0_12, %c0_13] : memref<16x32xf32, #tpu.memory_space<vmem>>, vector<16x32xf32>
      tpu.vector_store %arg5[%c0_12, %c0_13], %12 {strides = array<i32>} : memref<16x32xf32, #tpu.memory_space<vmem>>, vector<16x32xf32>,
    } else {
    }
    return
  }
  func.func @transform_0(%arg0: i32, %arg1: i32, %arg2: i32) -> (i32, i32) {
    %c0_i32 = arith.constant 0 : i32
    return %arg0, %arg2 : i32, i32
  }
  func.func @transform_1(%arg0: i32, %arg1: i32, %arg2: i32) -> (i32, i32) {
    %c0_i32 = arith.constant 0 : i32
    return %arg2, %arg1 : i32, i32
  }
  func.func @transform_2(%arg0: i32, %arg1: i32, %arg2: i32) -> (i32, i32) {
    %c0_i32 = arith.constant 0 : i32
    return %arg0, %arg1 : i32, i32
  }
}

</mosaic_0001>

<bundles_post_ra>
// kernel: tpu_custom_call.1
= control target key start
LH: loop header
LB: loop body
LE: loop exit
PB: predicated region body
PF: predicated region fallthrough
CT: control target
= control target key end

     0   :  { %7 = vsyncpa [#allocation4], 0  ;;  %s345_s0 = inlined_call_operand.hbm [shape: f32[16,32], index: 0, kind: input, shape index: {}]   ;;  %s346_s1 = inlined_call_operand.hbm [shape: f32[32,32], index: 1, kind: input, shape index: {}]   ;;  %s347_s2 = inlined_call_operand.hbm [shape: f32[16,32], index: 2, kind: output, shape index: {}]  }
   0x1   :  { %8 = vsyncpa [#allocation7], 0 }
   0x2   :  { %9 = vsyncpa [#allocation5], 0  ;;  %s271_s9 = smov [#allocation3]   ;;  %s199_s13 = scalar_lea.hbm %s345_s0, 256 }
   0x3   :  { %s15_s10 = sshll.u32 %s271_s9, 4  ;;  %p200_p0 = scmp.ne.s32.totalorder %s345_s0, %s199_s13  ;;  %s16_s10 = int_to_ptr.vmem [resolvable:$true] %s15_s10 }
   0x4   :  { %p203_p1 = scmp.lt.u32.totalorder %s199_s13, %s345_s0 }
   0x6   :  { %p205_p2 = pnand %p203_p1, %p200_p0 }
   0x8   :  { %208 = shalt.err (!%p205_p2)
}
   0x9   :  { %s209_s18 = scalar_lea.vmem %s16_s10, 256  ;;  %p214_p4 = scmp.lt.s32.totalorder %s16_s10, %s16_s10 }
   0xa   :  { %p210_p3 = scmp.ne.s32.totalorder %s16_s10, %s209_s18  ;;  %p215_p5 = scmp.lt.s32.totalorder %s209_s18, %s209_s18 }
   0xc   :  { %p216_p6 = por %p215_p5, %p214_p4 }
   0xe   :  { %p217_p7 = pnand %p216_p6, %p210_p3 }
  0x10   :  { %220 = shalt.err (!%p217_p7)
}
  0x11   :  { %s272_s19 = smov 128   ;;  %s273_s20 = smov 8  }
  0x12   :  { %21 = dma.hbm_to_vmem [thread:$0]  %s345_s0, 256, %s16_s10, [#allocation4], %s272_s19, %s272_s19, %s273_s20  }
  0x13   :  { %s274_s23 = smov [#allocation6]   ;;  %s221_s27 = scalar_lea.hbm %s346_s1, 512 }
  0x14   :  { %s27_s24 = sshll.u32 %s274_s23, 4  ;;  %p222_p8 = scmp.ne.s32.totalorder %s346_s1, %s221_s27  ;;  %s28_s24 = int_to_ptr.vmem [resolvable:$true] %s27_s24 }
  0x15   :  { %p225_p9 = scmp.lt.u32.totalorder %s221_s27, %s346_s1 }
  0x17   :  { %p227_p10 = pnand %p225_p9, %p222_p8 }
  0x19   :  { %230 = shalt.err (!%p227_p10)
}
  0x1a   :  { %s231_s4 = scalar_lea.vmem %s28_s24, 512  ;;  %p236_p12 = scmp.lt.s32.totalorder %s28_s24, %s28_s24 }
  0x1b   :  { %p232_p11 = scmp.ne.s32.totalorder %s28_s24, %s231_s4  ;;  %p237_p13 = scmp.lt.s32.totalorder %s231_s4, %s231_s4 }
  0x1d   :  { %p238_p0 = por %p237_p13, %p236_p12 }
  0x1f   :  { %p239_p1 = pnand %p238_p0, %p232_p11 }
  0x21   :  { %242 = shalt.err (!%p239_p1)
}
  0x22   :  { %33 = dma.hbm_to_vmem [thread:$0]  %s346_s1, 512, %s28_s24, [#allocation7], %s272_s19, %s272_s19, %s273_s20  }
  0x23   :  { %265 = dma.done.wait [#allocation4], 256  }
  0x24   :  { %266 = vsyncadd [#allocation4], 4294967040 }
  0x25   :  { %267 = dma.done.wait [#allocation7], 512  }
  0x26   :  { %268 = vsyncadd [#allocation7], 4294966784  ;;  %vm44_vm0 = vcmask 261120   ;;  %v275_v0 = vmov 0.0   ;;  %v51_v1 = vld [vmem:[#allocation6] sm:$0xff]  ;;  %v52_v2 = vld [vmem:[#allocation6 + $0x8] sm:$0xff] }
  0x27   :  { %46 = vst.msk [vmem:[#allocation2 + $0x8] sm:$0xff] %vm44_vm0, %v275_v0  ;;  %45 = vst.msk [vmem:[#allocation2] sm:$0xff] %vm44_vm0, %v275_v0  ;;  %v53_v3 = vld [vmem:[#allocation6 + $0x10] sm:$0xff]  ;;  %v185_v4 = vpack.c.bf16 %v52_v2, %v51_v1  ;;  %v54_v5 = vld [vmem:[#allocation6 + $0x18] sm:$0xff]  ;;  %s276_s1 = smov [#allocation8]  }
  0x28   :  { %v49_v6 = vld [vmem:[#allocation3] sm:$0xff]  ;;  %v189_v7 = vpack.c.bf16 %v54_v5, %v53_v3  ;;  %v50_v8 = vld [vmem:[#allocation3 + $0x8] sm:$0xff]  ;;  %s153_s6 = sshll.u32 %s276_s1, 4  ;;  %s154_s6 = int_to_ptr.vmem [resolvable:$true] %s153_s6 }
  0x29   :  { %182 = vmatprep.mubr.msk.f32.mxu0 %vm44_vm0, %v49_v6  ;;  %186 = vmatprep.subr.bf16.mxu0 %v185_v4  ;;  %s243_s7 = scalar_lea.vmem %s154_s6, 256  ;;  %p248_p3 = scmp.lt.s32.totalorder %s154_s6, %s154_s6 }
  0x2a   :  { %188 = vmatpush3.bf16.msra.mxu0 %v185_v4  ;;  %p244_p2 = scmp.ne.s32.totalorder %s154_s6, %s243_s7  ;;  %p249_p4 = scmp.lt.s32.totalorder %s243_s7, %s243_s7 }
  0x2b   :  { %190 = vmatprep.subr.bf16.mxu0 %v189_v7 }
  0x2c   :  { %p250_p5 = por %p249_p4, %p248_p3 }
  0x2e   :  { %192 = vmatpush3.bf16.msra.mxu0 %v189_v7  ;;  %v48_v9 = vld [vmem:[#allocation2 + $0x8] sm:$0xff]  ;;  %v47_v10 = vld [vmem:[#allocation2] sm:$0xff]  ;;  %p251_p6 = pnand %p250_p5, %p244_p2 }
  0x31   :  { %183 = vmatmul.mubr.msk.f32.vlgmr.msra.gmra.mrb[0].mxu0 %vm44_vm0, %v50_v8 }
 0x104   :  { %v184_v11 = vpop.f32.mrb[0].mxu0 }
 0x105   :  { %v138_v12 = vadd.f32 %v184_v11, %v48_v9  ;;  %v128_v13 = vpop.f32.mrb[1].mxu0 }
 0x106   :  { %v137_v14 = vadd.f32 %v128_v13, %v47_v10 }
 0x107   :  { %140 = vst.msk [vmem:[#allocation2 + $0x8] sm:$0xff] %vm44_vm0, %v138_v12 }
 0x108   :  { %139 = vst.msk [vmem:[#allocation2] sm:$0xff] %vm44_vm0, %v137_v14 }
 0x10e   :  { %v145_v15 = vld [vmem:[#allocation2 + $0x8] sm:$0xff] }
 0x10f   :  { %v144_v16 = vld [vmem:[#allocation2] sm:$0xff]  ;;  %147 = vst.msk [vmem:[#allocation8 + $0x8] sm:$0xff] %vm44_vm0, %v145_v15 }
 0x110   :  { %146 = vst.msk [vmem:[#allocation8] sm:$0xff] %vm44_vm0, %v144_v16 }
 0x111   :  { %254 = shalt.err (!%p251_p6)
}
 0x112   :  { %s255_s10 = scalar_lea.hbm %s347_s2, 256 }
 0x113   :  { %p256_p7 = scmp.ne.s32.totalorder %s347_s2, %s255_s10  ;;  %p259_p8 = scmp.lt.u32.totalorder %s255_s10, %s347_s2 }
 0x115   :  { %p261_p9 = pnand %p259_p8, %p256_p7 }
 0x117   :  { %264 = shalt.err (!%p261_p9)
}
 0x118   :  { %159 = dma.vmem_to_hbm [thread:$0]  %s154_s6, 256, %s347_s2, [#allocation5], %s272_s19, %s272_s19, %s273_s20  }
 0x119   :  { %269 = dma.done.wait [#allocation5], 256  }
 0x11a   :  { %270 = vsyncadd [#allocation5], 4294967040 }
 0x11b   :  { %163 = vsyncpa [#allocation4], 1 }
 0x11c   :  { %164 = vsyncpa [#allocation7], 1 }
 0x11d   :  { %165 = vsyncpa [#allocation5], 1 }

</bundles_post_ra>
